<compile_context>
chip_gen: v6e
topology: v6e:2x2x1
jax: 0.10.0
libtpu: 0.0.40
codegen_flags: <defaults>
</compile_context>

<pallas_src>
import math

import jax
import jax.numpy as jnp
from jax.experimental import pallas as pl
from jax.experimental.pallas import tpu as pltpu


# ----------------------------------------------------------------------------- kernels
def _factored_kernel(x_ref, a_ref, b_ref, o_ref):
    # x: (tm, inch)  a: (inch, r)  b: (r, outch_p)  o: (tm, outch_p)
    x = x_ref[...]
    if x.dtype != a_ref.dtype:          # static (trace-time) check
        x = x.astype(a_ref.dtype)
    xa = jnp.dot(x, a_ref[...], preferred_element_type=jnp.float32)       # (tm, r) f32
    y = jnp.dot(xa.astype(b_ref.dtype), b_ref[...],
                preferred_element_type=jnp.float32)                       # (tm, outch_p)
    o_ref[...] = y.astype(o_ref.dtype)


def _factored_ksplit_kernel(x_ref, a_ref, b_ref, o_ref, acc_ref):
    # Grid = (row tiles, inch tiles); inch ("arbitrary") is the trailing axis.
    k = pl.program_id(1)

    @pl.when(k == 0)
    def _():
        acc_ref[...] = jnp.zeros_like(acc_ref)

    x = x_ref[...]                                                        # (tm, tk)
    if x.dtype != a_ref.dtype:
        x = x.astype(a_ref.dtype)
    acc_ref[...] += jnp.dot(x, a_ref[...], preferred_element_type=jnp.float32)

    @pl.when(k == pl.num_programs(1) - 1)
    def _():
        y = jnp.dot(acc_ref[...].astype(b_ref.dtype), b_ref[...],
                    preferred_element_type=jnp.float32)
        o_ref[...] = y.astype(o_ref.dtype)


def _fused_kernel(x_ref, w_ref, o_ref):
    # x: (tm, inch)  w: (inch, outch_p)  o: (tm, outch_p)
    x = x_ref[...]
    if x.dtype != w_ref.dtype:
        x = x.astype(w_ref.dtype)
    o_ref[...] = jnp.dot(x, w_ref[...],
                         preferred_element_type=jnp.float32).astype(o_ref.dtype)


# ----------------------------------------------------------------------------- helpers
def _round_up(v, m):
    return -(-v // m) * m


def _vmem_caps():
    """(row-tile budget, vmem_limit cap) derived from this chip's VMEM size."""
    cap = 64 << 20                      # conservative default == v7x per-TC VMEM
    try:
        info = pltpu.get_tpu_info()
        q = getattr(info, "vmem_capacity_bytes", None)
        if q:
            cap = int(q)
    except Exception:
        pass
    budget = (cap * 3) // 4                         # ~96 MiB v5e/v6e, ~48 MiB v7x
    limit_cap = min(100 << 20, (cap * 13) // 16)    # ~100 MiB v5e/v6e, ~52 MiB v7x
    return budget, limit_cap


def _weight_spec(block_shape, index_map, single_buffer):
    """Spec for a weight block revisited at every grid step (constant index).

    single_buffer=True marks it pl.Buffered(1): a revisited block needs no
    double buffering, so its second VMEM copy is freed for larger row tiles.
    """
    if single_buffer:
        return pl.BlockSpec(block_shape, index_map, pipeline_mode=pl.Buffered(1))
    return pl.BlockSpec(block_shape, index_map)


def _pick_tm(M, per_row_bytes, resident_bytes, tm_max, budget):
    """Largest sublane-aligned row tile whose footprint fits the VMEM budget."""
    tm = 8
    for cand in (1024, 512, 256, 128, 64, 32, 16, 8):
        if cand > tm_max:
            continue
        if 2 * cand * per_row_bytes + resident_bytes <= budget:
            tm = cand
            break
    return min(tm, _round_up(max(M, 1), 8))


# ----------------------------------------------------------------------------- wrapper
def lora_linear(x, lora_a, lora_b, *, compute_dtype=jnp.bfloat16, out_dtype=None,
                mode="auto", tm_max=512, ksplit_tk=None):
    """y = x @ (lora_b @ lora_a).T  (== F.linear(x, lora_b @ lora_a))."""
    r, inch = lora_a.shape
    outch, r2 = lora_b.shape
    assert r == r2 and x.shape[-1] == inch

    lead = x.shape[:-1]
    M = int(math.prod(lead)) if lead else 1
    x2d = x.reshape(M, inch)
    out_dtype = x.dtype if out_dtype is None else out_dtype

    budget, vmem_cap = _vmem_caps()

    x_bytes = jnp.dtype(x.dtype).itemsize
    o_bytes = jnp.dtype(out_dtype).itemsize
    c_bytes = jnp.dtype(compute_dtype).itemsize

    # Lane-dense output: pad outch up to a multiple of 128 inside the kernel
    # (sliced off after the call).  Avoids masked vst.msk partial stores.
    outch_p = _round_up(outch, 128)
    per_row_bytes = inch * x_bytes + outch_p * o_bytes

    # ---- dispatch: fused single matmul vs factored two-dot LoRA ------------
    # Raw-flop crossover.  It errs toward the factored path, which is also the
    # safe choice on v5e (its MXU pads K=r only to 128, so the factored form
    # wastes less of the contraction dim there than on v6e/v7x).
    fused_w_bytes = inch * outch_p * c_bytes
    if mode == "auto":
        fused_cheaper = 2 * r * (inch + outch) >= inch * outch
        mode = "fused" if (fused_cheaper and fused_w_bytes <= (4 << 20)) else "factored"

    # ---- optional inch (K) split: keeps row tiles large for huge inch ------
    tk = None
    if mode == "factored":
        ksplit_min_inch = 4096 if budget <= (48 << 20) else 8192   # earlier on v7x
        want_ksplit = (ksplit_tk is not None) or (
            inch >= ksplit_min_inch
            and 2 * tm_max * per_row_bytes + (inch * r + r * outch_p) * c_bytes > budget)
        if want_ksplit:
            tk = ksplit_tk
            if tk is None:
                for cand in (2048, 1024, 512, 256, 128):
                    if inch % cand == 0:
                        tk = cand
                        break
            if tk is not None and inch % tk == 0 and inch > tk:
                mode = "factored_ksplit"
            else:
                tk = None

    scratch_shapes = ()
    if mode == "fused":
        # One-time host-side W in canonical (K, N) = (inch, outch_p) layout.
        w = jnp.dot(lora_a.T.astype(jnp.float32), lora_b.T.astype(jnp.float32))
        if outch_p != outch:
            w = jnp.pad(w, ((0, 0), (0, outch_p - outch)))
        w = w.astype(compute_dtype)
        resident_bytes = inch * outch_p * c_bytes
        tm = _pick_tm(M, per_row_bytes, resident_bytes, tm_max, budget)
        if M > 16:   # >= 2 grid steps so both v7x TensorCores get sharded work
            tm = min(tm, _round_up(-(-M // 2), 8))
        grid = (pl.cdiv(M, tm),)
        kernel = _fused_kernel
        operands = (x2d, w)
        dims = ("parallel",)

        def make_in_specs(sb):
            return [pl.BlockSpec((tm, inch), lambda i: (i, 0)),
                    _weight_spec((inch, outch_p), lambda i: (0, 0), sb)]

        out_spec = pl.BlockSpec((tm, outch_p), lambda i: (i, 0))
        flops = 2 * M * inch * outch_p
        vmem_need = 2 * tm * per_row_bytes + 2 * resident_bytes

    elif mode == "factored":
        a = lora_a.T.astype(compute_dtype)             # (inch, r)  canonical (K, N)
        b = lora_b.T.astype(compute_dtype)             # (r, outch) canonical (K, N)
        if outch_p != outch:
            b = jnp.pad(b, ((0, 0), (0, outch_p - outch)))
        resident_bytes = (inch * r + r * outch_p) * c_bytes
        tm = _pick_tm(M, per_row_bytes, resident_bytes, tm_max, budget)
        if M > 16:
            tm = min(tm, _round_up(-(-M // 2), 8))
        grid = (pl.cdiv(M, tm),)
        kernel = _factored_kernel
        operands = (x2d, a, b)
        dims = ("parallel",)

        def make_in_specs(sb):
            return [pl.BlockSpec((tm, inch), lambda i: (i, 0)),
                    _weight_spec((inch, r), lambda i: (0, 0), sb),
                    _weight_spec((r, outch_p), lambda i: (0, 0), sb)]

        out_spec = pl.BlockSpec((tm, outch_p), lambda i: (i, 0))
        flops = 2 * M * r * (inch + outch_p)
        vmem_need = 2 * tm * per_row_bytes + 2 * resident_bytes

    else:  # "factored_ksplit"
        a = lora_a.T.astype(compute_dtype)             # (inch, r)
        b = lora_b.T.astype(compute_dtype)             # (r, outch)
        if outch_p != outch:
            b = jnp.pad(b, ((0, 0), (0, outch_p - outch)))
        resident_bytes = (inch * r + r * outch_p) * c_bytes
        per_row_k = tk * x_bytes + outch_p * o_bytes + r * 4   # + f32 acc row
        tm = _pick_tm(M, per_row_k, resident_bytes, tm_max, budget)
        if M > 16:
            tm = min(tm, _round_up(-(-M // 2), 8))
        grid = (pl.cdiv(M, tm), inch // tk)
        kernel = _factored_ksplit_kernel
        operands = (x2d, a, b)
        dims = ("parallel", "arbitrary")                # reduction axis last
        scratch_shapes = (pltpu.VMEM((tm, r), jnp.float32),)

        def make_in_specs(sb):
            return [pl.BlockSpec((tm, tk), lambda i, k: (i, k)),
                    pl.BlockSpec((tk, r), lambda i, k: (k, 0)),     # streamed over k
                    _weight_spec((r, outch_p), lambda i, k: (0, 0), sb)]

        out_spec = pl.BlockSpec((tm, outch_p), lambda i, k: (i, 0))
        flops = 2 * M * r * (inch + outch_p)
        vmem_need = 2 * tm * per_row_k + 2 * resident_bytes + tm * r * 4

    bytes_accessed = M * per_row_bytes + resident_bytes
    vmem_limit = int(min(vmem_cap, max(32 << 20, vmem_need * 3 // 2)))

    def _run(single_buffer_weights):
        return pl.pallas_call(
            kernel,
            out_shape=jax.ShapeDtypeStruct((M, outch_p), out_dtype),
            grid_spec=pltpu.PrefetchScalarGridSpec(
                num_scalar_prefetch=0,
                grid=grid,
                in_specs=make_in_specs(single_buffer_weights),
                out_specs=out_spec,
                scratch_shapes=scratch_shapes),
            compiler_params=pltpu.CompilerParams(
                dimension_semantics=dims,
                vmem_limit_bytes=vmem_limit),
            cost_estimate=pl.CostEstimate(
                flops=flops, transcendentals=0, bytes_accessed=bytes_accessed),
        )(*operands)

    try:
        out = _run(True)        # single-buffer the revisited weight blocks
    except Exception:           # fallback if pl.Buffered(1) is not supported here
        out = _run(False)

    if outch_p != outch:
        out = out[:, :outch]
    return out.reshape(*lead, outch)


# ----------------------------------------------------------------------------- init
def init_lora_params(key, inch, outch, dim_r, dtype=jnp.float32):
    """Parameter init matching the module's shapes.

    NOTE: PyTorch's __init__ leaves lora_b = 0 (module outputs zeros at init);
    here lora_b is drawn from a small uniform too so the kernel is exercised
    non-trivially.  lora_a uses kaiming_uniform_(a=sqrt(5)) bounds.
    """
    ka, kb = jax.random.split(key)
    bound_a = 1.0 / math.sqrt(inch)
    lora_a = jax.random.uniform(ka, (dim_r, inch), dtype, -bound_a, bound_a)
    bound_b = 1.0 / math.sqrt(dim_r)
    lora_b = jax.random.uniform(kb, (outch, dim_r), dtype, -bound_b, bound_b)
    return lora_a, lora_b


# ----------------------------------------------------------------------------- demo
if __name__ == "__main__":
    batch, seq, inch, outch, dim_r = 2, 8, 32, 32, 8

    key = jax.random.PRNGKey(0)
    kx, kp = jax.random.split(key)
    x = jax.random.normal(kx, (batch, seq, inch), dtype=jnp.float32)
    lora_a, lora_b = init_lora_params(kp, inch, outch, dim_r)

    # Pure-JAX f32 reference: y = x @ (lora_b @ lora_a).T
    w = lora_b @ lora_a
    y_ref = jnp.einsum("bsi,oi->bso", x, w)

    # Auto dispatch (tiny toy shapes -> fused-W kernel).
    y_auto = lora_linear(x, lora_a, lora_b)
    # Force the factored two-dot kernel (the production LoRA regime).
    y_fact = lora_linear(x, lora_a, lora_b, mode="factored")
    jax.block_until_ready((y_auto, y_fact))
    assert y_auto.shape == (batch, seq, outch)
    assert y_fact.shape == (batch, seq, outch)
    assert jnp.allclose(y_auto, y_ref, atol=3e-2, rtol=3e-2)
    assert jnp.allclose(y_fact, y_ref, atol=3e-2, rtol=3e-2)

    # bf16 activations in / bf16 out: no f32 HBM traffic on the mem-bound path.
    xb = x.astype(jnp.bfloat16)
    yb = lora_linear(xb, lora_a, lora_b, mode="factored")
    jax.block_until_ready(yb)
    assert yb.dtype == jnp.bfloat16
    assert jnp.allclose(yb.astype(jnp.float32), y_ref, atol=5e-2, rtol=5e-2)

    # Ragged-M path: M = 15 rows, masked partial tile, no host-side pad of x.
    x3 = jax.random.normal(kx, (3, 5, inch), dtype=jnp.float32)
    y3 = lora_linear(x3, lora_a, lora_b, mode="factored")
    jax.block_until_ready(y3)
    y3_ref = jnp.einsum("bsi,oi->bso", x3, w)
    assert y3.shape == (3, 5, outch)
    assert jnp.allclose(y3, y3_ref, atol=3e-2, rtol=3e-2)

    # inch-split path (reduction grid axis + f32 accumulator), forced small.
    inch2 = 256
    xk = jax.random.normal(kx, (batch, seq, inch2), dtype=jnp.float32)
    la2, lb2 = init_lora_params(kp, inch2, outch, dim_r)
    yk = lora_linear(xk, la2, lb2, mode="factored", ksplit_tk=128)
    jax.block_until_ready(yk)
    yk_ref = jnp.einsum("bsi,oi->bso", xk, lb2 @ la2)
    assert yk.shape == (batch, seq, outch)
    assert jnp.allclose(yk, yk_ref, atol=3e-2, rtol=3e-2)

    print("KERNEL_OK")
</pallas_src>

<mosaic_0001>
module attributes {stable_mosaic.version = 11 : i64} {
  func.func @_fused_kernel(%arg0: i32, %arg1: memref<16x32xf32, #tpu.memory_space<vmem>>, %arg2: memref<32x128xbf16, #tpu.memory_space<vmem>>, %arg3: memref<16x128xf32, #tpu.memory_space<vmem>>) attributes {dimension_semantics = [#tpu.dimension_semantics<parallel>], iteration_bounds = array<i64: 1>, scalar_prefetch = 0 : i64, scratch_operands = 0 : i64, tpu.core_type = #tpu.core_type<tc>, window_params = [{transform_indices = @transform_0, window_bounds = array<i64: 16, 32>}, {pipeline_mode = #tpu.pipeline_mode<synchronous>, transform_indices = @transform_1, window_bounds = array<i64: 32, 128>}, {transform_indices = @transform_2, window_bounds = array<i64: 16, 128>}]} {
    %c0 = arith.constant 0 : index
    %c0_0 = arith.constant 0 : index
    %0 = vector.load %arg1[%c0, %c0_0] : memref<16x32xf32, #tpu.memory_space<vmem>>, vector<16x32xf32>
    %1 = arith.truncf %0 : vector<16x32xf32> to vector<16x32xbf16>
    %c0_1 = arith.constant 0 : index
    %c0_2 = arith.constant 0 : index
    %2 = vector.load %arg2[%c0_1, %c0_2] : memref<32x128xbf16, #tpu.memory_space<vmem>>, vector<32x128xbf16>
    %cst = arith.constant dense<0.000000e+00> : vector<16x128xf32>
    %3 = tpu.matmul %1, %2, %cst {dimension_numbers = #tpu.dot_dimension_numbers<[1], [0], [0], [1], [0, 0, 1, 1], [], []>} : vector<16x32xbf16>, vector<32x128xbf16>, vector<16x128xf32> -> vector<16x128xf32>
    %c0_3 = arith.constant 0 : index
    %c0_4 = arith.constant 0 : index
    %4 = vector.load %arg3[%c0_3, %c0_4] : memref<16x128xf32, #tpu.memory_space<vmem>>, vector<16x128xf32>
    tpu.vector_store %arg3[%c0_3, %c0_4], %3 {strides = array<i32>} : memref<16x128xf32, #tpu.memory_space<vmem>>, vector<16x128xf32>,
    return
  }
  func.func @transform_0(%arg0: i32) -> (i32, i32) {
    %c0_i32 = arith.constant 0 : i32
    %c0_i32_0 = arith.constant 0 : i32
    return %arg0, %c0_i32 : i32, i32
  }
  func.func @transform_1(%arg0: i32) -> (i32, i32) {
    %c0_i32 = arith.constant 0 : i32
    %c0_i32_0 = arith.constant 0 : i32
    %c0_i32_1 = arith.constant 0 : i32
    return %c0_i32, %c0_i32_0 : i32, i32
  }
  func.func @transform_2(%arg0: i32) -> (i32, i32) {
    %c0_i32 = arith.constant 0 : i32
    %c0_i32_0 = arith.constant 0 : i32
    return %arg0, %c0_i32 : i32, i32
  }
}

module attributes {stable_mosaic.version = 11 : i64} {
  func.func @_fused_kernel(%arg0: i32, %arg1: memref<16x32xf32, #tpu.memory_space<vmem>>, %arg2: memref<32x128xbf16, #tpu.memory_space<vmem>>, %arg3: memref<16x128xf32, #tpu.memory_space<vmem>>) attributes {dimension_semantics = [#tpu.dimension_semantics<parallel>], iteration_bounds = array<i64: 1>, scalar_prefetch = 0 : i64, scratch_operands = 0 : i64, tpu.core_type = #tpu.core_type<tc>, window_params = [{transform_indices = @transform_0, window_bounds = array<i64: 16, 32>}, {pipeline_mode = #tpu.pipeline_mode<synchronous>, transform_indices = @transform_1, window_bounds = array<i64: 32, 128>}, {transform_indices = @transform_2, window_bounds = array<i64: 16, 128>}]} {
    %c0 = arith.constant 0 : index
    %c0_0 = arith.constant 0 : index
    %0 = vector.load %arg1[%c0, %c0_0] : memref<16x32xf32, #tpu.memory_space<vmem>>, vector<16x32xf32>
    %1 = arith.truncf %0 : vector<16x32xf32> to vector<16x32xbf16>
    %c0_1 = arith.constant 0 : index
    %c0_2 = arith.constant 0 : index
    %2 = vector.load %arg2[%c0_1, %c0_2] : memref<32x128xbf16, #tpu.memory_space<vmem>>, vector<32x128xbf16>
    %cst = arith.constant dense<0.000000e+00> : vector<16x128xf32>
    %3 = tpu.matmul %1, %2, %cst {dimension_numbers = #tpu.dot_dimension_numbers<[1], [0], [0], [1], [0, 0, 1, 1], [], []>} : vector<16x32xbf16>, vector<32x128xbf16>, vector<16x128xf32> -> vector<16x128xf32>
    %c0_3 = arith.constant 0 : index
    %c0_4 = arith.constant 0 : index
    %4 = vector.load %arg3[%c0_3, %c0_4] : memref<16x128xf32, #tpu.memory_space<vmem>>, vector<16x128xf32>
    tpu.vector_store %arg3[%c0_3, %c0_4], %3 {strides = array<i32>} : memref<16x128xf32, #tpu.memory_space<vmem>>, vector<16x128xf32>,
    return
  }
  func.func @transform_0(%arg0: i32) -> (i32, i32) {
    %c0_i32 = arith.constant 0 : i32
    %c0_i32_0 = arith.constant 0 : i32
    return %arg0, %c0_i32 : i32, i32
  }
  func.func @transform_1(%arg0: i32) -> (i32, i32) {
    %c0_i32 = arith.constant 0 : i32
    %c0_i32_0 = arith.constant 0 : i32
    %c0_i32_1 = arith.constant 0 : i32
    return %c0_i32, %c0_i32_0 : i32, i32
  }
  func.func @transform_2(%arg0: i32) -> (i32, i32) {
    %c0_i32 = arith.constant 0 : i32
    %c0_i32_0 = arith.constant 0 : i32
    return %arg0, %c0_i32 : i32, i32
  }
}

</mosaic_0001>

<bundles_post_ra>
// kernel: tpu_custom_call.1
= control target key start
LH: loop header
LB: loop body
LE: loop exit
PB: predicated region body
PF: predicated region fallthrough
CT: control target
= control target key end

     0   :  { %7 = vsyncpa [#allocation3], 0  ;;  %s255_s0 = inlined_call_operand.hbm [shape: f32[16,32], index: 0, kind: input, shape index: {}]   ;;  %s256_s1 = inlined_call_operand.hbm [shape: bf16[32,128], index: 1, kind: input, shape index: {}]   ;;  %s257_s2 = inlined_call_operand.hbm [shape: f32[16,128], index: 2, kind: output, shape index: {}]  }
   0x1   :  { %8 = vsyncpa [#allocation6], 0 }
   0x2   :  { %9 = vsyncpa [#allocation4], 0  ;;  %s216_s9 = smov [#allocation2]  }
   0x3   :  { %s15_s10 = sshll.u32 %s216_s9, 4  ;;  %s16_s10 = int_to_ptr.vmem [resolvable:$true] %s15_s10 }
   0x4   :  { %s158_s11 = scalar_lea.vmem %s16_s10, 256  ;;  %p163_p1 = scmp.lt.s32.totalorder %s16_s10, %s16_s10 }
   0x5   :  { %p159_p0 = scmp.ne.s32.totalorder %s16_s10, %s158_s11  ;;  %p164_p2 = scmp.lt.s32.totalorder %s158_s11, %s158_s11 }
   0x7   :  { %p165_p3 = por %p164_p2, %p163_p1 }
   0x9   :  { %p166_p4 = pnand %p165_p3, %p159_p0 }
   0xb   :  { %169 = shalt.err (!%p166_p4)
}
   0xc   :  { %s217_s12 = smov 128   ;;  %s218_s13 = smov 8  }
   0xd   :  { %21 = dma.hbm_to_vmem [thread:$0]  %s255_s0, 256, %s16_s10, [#allocation3], %s217_s12, %s217_s12, %s218_s13  }
   0xe   :  { %s219_s16 = smov [#allocation5]  }
   0xf   :  { %s27_s17 = sshll.u32 %s219_s16, 4  ;;  %s28_s17 = int_to_ptr.vmem [resolvable:$true] %s27_s17 }
  0x10   :  { %s178_s18 = scalar_lea.vmem %s28_s17, 256  ;;  %p183_p6 = scmp.lt.s32.totalorder %s28_s17, %s28_s17 }
  0x11   :  { %p179_p5 = scmp.ne.s32.totalorder %s28_s17, %s178_s18  ;;  %p184_p7 = scmp.lt.s32.totalorder %s178_s18, %s178_s18 }
  0x13   :  { %p185_p8 = por %p184_p7, %p183_p6 }
  0x15   :  { %p186_p9 = pnand %p185_p8, %p179_p5 }
  0x17   :  { %189 = shalt.err (!%p186_p9)
}
  0x18   :  { %s220_s19 = smov 64   ;;  %s221_s20 = smov 4  }
  0x19   :  { %33 = dma.hbm_to_vmem [thread:$0]  %s256_s1, 256, %s28_s17, [#allocation6], %s220_s19, %s220_s19, %s221_s20  }
  0x1a   :  { %210 = dma.done.wait [#allocation3], 256  }
  0x1b   :  { %211 = vsyncadd [#allocation3], 4294967040 }
  0x1c   :  { %212 = dma.done.wait [#allocation6], 256  }
  0x1d   :  { %213 = vsyncadd [#allocation6], 4294967040  ;;  %v222_v0 = vmov 0.0   ;;  %vm223_vm0 = vmmov 0   ;;  %v148_v1 = vld [vmem:[#allocation5 + $0x8] sm:$0xff]   ;;  %v149_v2 = vld [vmem:[#allocation5] sm:$0xff]  }
  0x1e   :  { %131 = vmatprep.subr.bf16.mxu0 %v222_v0  ;;  %135 = vmatprep.mubr.msk.bf16.mxu0 %vm223_vm0, %v222_v0  ;;  %v41_v3 = vld [vmem:[#allocation2] sm:$0xff]  ;;  %v42_v4 = vld [vmem:[#allocation2 + $0x8] sm:$0xff]  ;;  %vm60_vm1 = vcmask 261120   ;;  %s224_s0 = smov [#allocation7]  }
  0x1f   :  { %132 = vmatpush3.bf16.msra.mxu0 %v148_v1  ;;  %v43_v5 = vpack.c.bf16 %v42_v4, %v41_v3  ;;  %s112_s1 = sshll.u32 %s224_s0, 4  ;;  %s113_s1 = int_to_ptr.vmem [resolvable:$true] %s112_s1 }
  0x20   :  { %133 = vmatprep.subr.bf16.mxu0 %v222_v0  ;;  %s190_s23 = scalar_lea.vmem %s113_s1, 256  ;;  %p195_p11 = scmp.lt.s32.totalorder %s113_s1, %s113_s1 }
  0x21   :  { %p191_p10 = scmp.ne.s32.totalorder %s113_s1, %s190_s23  ;;  %p196_p12 = scmp.lt.s32.totalorder %s190_s23, %s190_s23 }
  0x23   :  { %134 = vmatpush3.bf16.msra.mxu0 %v149_v2  ;;  %p197_p13 = por %p196_p12, %p195_p11 }
  0x25   :  { %p198_p0 = pnand %p197_p13, %p191_p10 }
  0x26   :  { %136 = vmatmul.mubr.msk.bf16.vlgmr.msra.gmra.mxu0 %vm60_vm1, %v43_v5 }
  0xe6   :  { %v98_v6 = vpop.f32.mrf.mxu0 }
  0xe7   :  { %105 = vst [vmem:[#allocation7] sm:$0xff] %v98_v6 }
  0xe8   :  { %v137_v7 = vpop.f32.mrf.mxu0 }
  0xea   :  { %v101_v8 = vpop.f32.mrf.mxu0 }
  0xeb   :  { %106 = vst [vmem:[#allocation7 + $0x8] sm:$0xff] %v101_v8 }
  0xec   :  { %v138_v9 = vpop.f32.mrf.mxu0 }
  0xed   :  { %201 = shalt.err (!%p198_p0)
}
  0xee   :  { %118 = dma.vmem_to_hbm [thread:$0]  %s113_s1, 256, %s257_s2, [#allocation4], %s217_s12, %s217_s12, %s218_s13  }
  0xef   :  { %214 = dma.done.wait [#allocation4], 256  }
  0xf0   :  { %215 = vsyncadd [#allocation4], 4294967040 }
  0xf1   :  { %122 = vsyncpa [#allocation3], 1 }
  0xf2   :  { %123 = vsyncpa [#allocation6], 1 }
  0xf3   :  { %124 = vsyncpa [#allocation4], 1 }

// kernel: tpu_custom_call.1
= control target key start
LH: loop header
LB: loop body
LE: loop exit
PB: predicated region body
PF: predicated region fallthrough
CT: control target
= control target key end

     0   :  { %7 = vsyncpa [#allocation3], 0  ;;  %s255_s0 = inlined_call_operand.hbm [shape: f32[16,32], index: 0, kind: input, shape index: {}]   ;;  %s256_s1 = inlined_call_operand.hbm [shape: bf16[32,128], index: 1, kind: input, shape index: {}]   ;;  %s257_s2 = inlined_call_operand.hbm [shape: f32[16,128], index: 2, kind: output, shape index: {}]  }
   0x1   :  { %8 = vsyncpa [#allocation6], 0 }
   0x2   :  { %9 = vsyncpa [#allocation4], 0  ;;  %s216_s9 = smov [#allocation2]  }
   0x3   :  { %s15_s10 = sshll.u32 %s216_s9, 4  ;;  %s16_s10 = int_to_ptr.vmem [resolvable:$true] %s15_s10 }
   0x4   :  { %s158_s11 = scalar_lea.vmem %s16_s10, 256  ;;  %p163_p1 = scmp.lt.s32.totalorder %s16_s10, %s16_s10 }
   0x5   :  { %p159_p0 = scmp.ne.s32.totalorder %s16_s10, %s158_s11  ;;  %p164_p2 = scmp.lt.s32.totalorder %s158_s11, %s158_s11 }
   0x7   :  { %p165_p3 = por %p164_p2, %p163_p1 }
   0x9   :  { %p166_p4 = pnand %p165_p3, %p159_p0 }
   0xb   :  { %169 = shalt.err (!%p166_p4)
}
   0xc   :  { %s217_s12 = smov 128   ;;  %s218_s13 = smov 8  }
   0xd   :  { %21 = dma.hbm_to_vmem [thread:$0]  %s255_s0, 256, %s16_s10, [#allocation3], %s217_s12, %s217_s12, %s218_s13  }
   0xe   :  { %s219_s16 = smov [#allocation5]  }
   0xf   :  { %s27_s17 = sshll.u32 %s219_s16, 4  ;;  %s28_s17 = int_to_ptr.vmem [resolvable:$true] %s27_s17 }
  0x10   :  { %s178_s18 = scalar_lea.vmem %s28_s17, 256  ;;  %p183_p6 = scmp.lt.s32.totalorder %s28_s17, %s28_s17 }
  0x11   :  { %p179_p5 = scmp.ne.s32.totalorder %s28_s17, %s178_s18  ;;  %p184_p7 = scmp.lt.s32.totalorder %s178_s18, %s178_s18 }
  0x13   :  { %p185_p8 = por %p184_p7, %p183_p6 }
  0x15   :  { %p186_p9 = pnand %p185_p8, %p179_p5 }
  0x17   :  { %189 = shalt.err (!%p186_p9)
}
  0x18   :  { %s220_s19 = smov 64   ;;  %s221_s20 = smov 4  }
  0x19   :  { %33 = dma.hbm_to_vmem [thread:$0]  %s256_s1, 256, %s28_s17, [#allocation6], %s220_s19, %s220_s19, %s221_s20  }
  0x1a   :  { %210 = dma.done.wait [#allocation3], 256  }
  0x1b   :  { %211 = vsyncadd [#allocation3], 4294967040 }
  0x1c   :  { %212 = dma.done.wait [#allocation6], 256  }
  0x1d   :  { %213 = vsyncadd [#allocation6], 4294967040  ;;  %v222_v0 = vmov 0.0   ;;  %vm223_vm0 = vmmov 0   ;;  %v148_v1 = vld [vmem:[#allocation5 + $0x8] sm:$0xff]   ;;  %v149_v2 = vld [vmem:[#allocation5] sm:$0xff]  }
  0x1e   :  { %131 = vmatprep.subr.bf16.mxu0 %v222_v0  ;;  %135 = vmatprep.mubr.msk.bf16.mxu0 %vm223_vm0, %v222_v0  ;;  %v41_v3 = vld [vmem:[#allocation2] sm:$0xff]  ;;  %v42_v4 = vld [vmem:[#allocation2 + $0x8] sm:$0xff]  ;;  %vm60_vm1 = vcmask 261120   ;;  %s224_s0 = smov [#allocation7]  }
  0x1f   :  { %132 = vmatpush3.bf16.msra.mxu0 %v148_v1  ;;  %v43_v5 = vpack.c.bf16 %v42_v4, %v41_v3  ;;  %s112_s1 = sshll.u32 %s224_s0, 4  ;;  %s113_s1 = int_to_ptr.vmem [resolvable:$true] %s112_s1 }
  0x20   :  { %133 = vmatprep.subr.bf16.mxu0 %v222_v0  ;;  %s190_s23 = scalar_lea.vmem %s113_s1, 256  ;;  %p195_p11 = scmp.lt.s32.totalorder %s113_s1, %s113_s1 }
  0x21   :  { %p191_p10 = scmp.ne.s32.totalorder %s113_s1, %s190_s23  ;;  %p196_p12 = scmp.lt.s32.totalorder %s190_s23, %s190_s23 }
  0x23   :  { %134 = vmatpush3.bf16.msra.mxu0 %v149_v2  ;;  %p197_p13 = por %p196_p12, %p195_p11 }
  0x25   :  { %p198_p0 = pnand %p197_p13, %p191_p10 }
  0x26   :  { %136 = vmatmul.mubr.msk.bf16.vlgmr.msra.gmra.mxu0 %vm60_vm1, %v43_v5 }
  0xe6   :  { %v98_v6 = vpop.f32.mrf.mxu0 }
  0xe7   :  { %105 = vst [vmem:[#allocation7] sm:$0xff] %v98_v6 }
  0xe8   :  { %v137_v7 = vpop.f32.mrf.mxu0 }
  0xea   :  { %v101_v8 = vpop.f32.mrf.mxu0 }
  0xeb   :  { %106 = vst [vmem:[#allocation7 + $0x8] sm:$0xff] %v101_v8 }
  0xec   :  { %v138_v9 = vpop.f32.mrf.mxu0 }
  0xed   :  { %201 = shalt.err (!%p198_p0)
}
  0xee   :  { %118 = dma.vmem_to_hbm [thread:$0]  %s113_s1, 256, %s257_s2, [#allocation4], %s217_s12, %s217_s12, %s218_s13  }
  0xef   :  { %214 = dma.done.wait [#allocation4], 256  }
  0xf0   :  { %215 = vsyncadd [#allocation4], 4294967040 }
  0xf1   :  { %122 = vsyncpa [#allocation3], 1 }
  0xf2   :  { %123 = vsyncpa [#allocation6], 1 }
  0xf3   :  { %124 = vsyncpa [#allocation4], 1 }

</bundles_post_ra>
